<compile_context>
chip_gen: v5e
topology: v5e:2x2
jax: 0.10.0
libtpu: 0.0.40
codegen_flags: <defaults>
</compile_context>

<pallas_src>
import functools

import jax
import jax.numpy as jnp
from jax.experimental import pallas as pl
from jax.experimental.pallas import tpu as pltpu


def _up_conv_kernel(p_ref, w_ref, b_ref, o_ref, sum_ref, ssq_ref, *,
                    neg_slope, eps, hw_tile, hw_total):
    # p_ref: (K_pad, hw_tile) bf16      w_ref: (co_tile, K_pad) bf16
    # b_ref: (co_tile, 1) f32           o_ref: (co_tile, HW) f32  (resident over hw)
    # sum_ref/ssq_ref: (co_tile, 1) f32 scratch (persist across hw steps)
    s = pl.program_id(2)

    @pl.when(s == 0)
    def _():
        sum_ref[...] = jnp.zeros_like(sum_ref)
        ssq_ref[...] = jnp.zeros_like(ssq_ref)

    # ---- 3x3 conv as one MXU matmul over the receptive field, f32 accum ----
    y = jnp.dot(w_ref[...], p_ref[...], preferred_element_type=jnp.float32)
    y = y + b_ref[...]                                  # bias (broadcast on lanes)

    # ---- LeakyReLU (negative_slope=0.01) ----
    y = jnp.maximum(y, neg_slope * y)

    # ---- InstanceNorm stats: one pass, sum & sum-of-squares ----
    sum_ref[...] += jnp.sum(y, axis=-1, keepdims=True)
    ssq_ref[...] += jnp.sum(y * y, axis=-1, keepdims=True)

    # ---- stash the activation slab into the HW-resident output block ----
    start = pl.multiple_of(s * hw_tile, hw_tile)
    o_ref[:, pl.ds(start, hw_tile)] = y.astype(o_ref.dtype)

    # ---- finalize: normalize the whole resident (co_tile, HW) block ----
    @pl.when(s == pl.num_programs(2) - 1)
    def _():
        inv_n = 1.0 / float(hw_total)
        mean = sum_ref[...] * inv_n
        var = ssq_ref[...] * inv_n - mean * mean        # biased var, like PyTorch
        scale = jax.lax.rsqrt(var + eps)
        o_ref[...] = ((o_ref[...] - mean) * scale).astype(o_ref.dtype)


def up_conv(x, weight, bias, *, eps=1e-5, negative_slope=0.01):
    """x: (B, C_in, H, W) f32; weight: (C_out, C_in, 3, 3) OIHW; bias: (C_out,)."""
    B, C_in, H, W = x.shape
    C_out = weight.shape[0]
    HW = H * W
    K = 9 * C_in
    K_pad = -(-K // 16) * 16            # bf16 sublane-friendly contraction length

    # ---- im2col in the wrapper (tap-major (ky,kx), then c), K padded, bf16 ----
    xp = jnp.pad(x, ((0, 0), (0, 0), (1, 1), (1, 1)))
    cols = [xp[:, :, ky:ky + H, kx:kx + W] for ky in range(3) for kx in range(3)]
    patches = jnp.stack(cols, axis=1).reshape(B, K, HW)
    if K_pad != K:
        patches = jnp.pad(patches, ((0, 0), (0, K_pad - K), (0, 0)))
    patches = patches.astype(jnp.bfloat16)

    w2d = jnp.transpose(weight, (0, 2, 3, 1)).reshape(C_out, K)
    if K_pad != K:
        w2d = jnp.pad(w2d, ((0, 0), (0, K_pad - K)))
    w2d = w2d.astype(jnp.bfloat16)
    b2d = bias.reshape(C_out, 1).astype(jnp.float32)

    # ---- channel tile: 256 for the wide v6e/v7x MXU, else 128, else full ----
    if C_out >= 256 and C_out % 256 == 0:
        co_tile = 256
    elif C_out % 128 == 0:
        co_tile = 128
    else:
        co_tile = C_out
    # v7x megacore: make sure the parallel grid has >= 2 cells when possible.
    while B * (C_out // co_tile) < 2 and co_tile % 16 == 0:
        co_tile //= 2

    # ---- spatial tile: lane-dense multiple of 128, capped at 2048 lanes ----
    hw_tile = HW
    for cand in (2048, 1024, 512, 256, 128):
        if HW % cand == 0:
            hw_tile = cand
            break

    grid = (B, C_out // co_tile, HW // hw_tile)

    # ---- VMEM budget (double-buffered blocks + resident output), cap 48 MiB ----
    blk_bytes = (K_pad * hw_tile * 2          # patches tile (bf16)
                 + co_tile * K_pad * 2        # weight tile (bf16)
                 + co_tile * 4                # bias tile
                 + co_tile * HW * 4)          # HW-resident output accumulator
    vmem_limit = int(min(max(2 * blk_bytes + (4 << 20), 32 << 20), 48 << 20))

    kernel = functools.partial(_up_conv_kernel, neg_slope=negative_slope,
                               eps=eps, hw_tile=hw_tile, hw_total=HW)

    out = pl.pallas_call(
        kernel,
        out_shape=jax.ShapeDtypeStruct((B, C_out, HW), jnp.float32),
        grid_spec=pltpu.PrefetchScalarGridSpec(
            num_scalar_prefetch=0,
            grid=grid,
            in_specs=[
                # patches: tiled over hw, index ignores the channel axis.
                pl.BlockSpec((None, K_pad, hw_tile), lambda b, c, s: (b, 0, s)),
                # weights/bias: resident across all hw steps of a channel tile.
                pl.BlockSpec((co_tile, K_pad), lambda b, c, s: (c, 0)),
                pl.BlockSpec((co_tile, 1), lambda b, c, s: (c, 0)),
            ],
            # Output block index ignores hw -> stays resident in VMEM across the
            # hw ("arbitrary") axis and is written back when (b, c) changes.
            out_specs=pl.BlockSpec((None, co_tile, HW), lambda b, c, s: (b, c, 0)),
            scratch_shapes=[
                pltpu.VMEM((co_tile, 1), jnp.float32),   # running sum
                pltpu.VMEM((co_tile, 1), jnp.float32),   # running sum of squares
            ],
        ),
        compiler_params=pltpu.CompilerParams(
            dimension_semantics=("parallel", "parallel", "arbitrary"),
            vmem_limit_bytes=vmem_limit,
        ),
    )(patches, w2d, b2d)

    return out.reshape(B, C_out, H, W)


def up_conv_ref(x, weight, bias, *, eps=1e-5, negative_slope=0.01):
    """Pure-JAX reference mirroring the PyTorch forward (f32, HIGHEST precision)."""
    y = jax.lax.conv_general_dilated(
        x, weight, window_strides=(1, 1), padding=((1, 1), (1, 1)),
        dimension_numbers=("NCHW", "OIHW", "NCHW"),
        precision=jax.lax.Precision.HIGHEST)
    y = y + bias[None, :, None, None]
    y = jnp.where(y >= 0, y, negative_slope * y)
    mean = jnp.mean(y, axis=(2, 3), keepdims=True)
    var = jnp.var(y, axis=(2, 3), keepdims=True)         # biased, like InstanceNorm
    return (y - mean) * jax.lax.rsqrt(var + eps)


if __name__ == "__main__":
    B, C_in, C_out, H, W = 2, 4, 8, 16, 16

    key = jax.random.PRNGKey(0)
    kx, kw, kb = jax.random.split(key, 3)
    x = jax.random.normal(kx, (B, C_in, H, W), dtype=jnp.float32)
    weight = (jax.random.normal(kw, (C_out, C_in, 3, 3), dtype=jnp.float32)
              * (1.0 / jnp.sqrt(9.0 * C_in)))
    bias = jax.random.normal(kb, (C_out,), dtype=jnp.float32) * 0.1

    out = jax.block_until_ready(up_conv(x, weight, bias))
    ref = up_conv_ref(x, weight, bias)

    assert out.shape == (B, C_out, H, W)
    # Tolerance covers bf16 rounding of the MXU operands (kernel) vs the f32
    # HIGHEST-precision reference; post-InstanceNorm outputs are unit-variance,
    # so any structural error would blow past this by orders of magnitude.
    err = float(jnp.max(jnp.abs(out - ref)))
    assert jnp.allclose(out, ref, atol=2e-2, rtol=2e-2), (
        f"mismatch vs reference, max err {err}")

    print("KERNEL_OK")
</pallas_src>

<mosaic_0001>
module attributes {stable_mosaic.version = 11 : i64} {
  func.func @_up_conv_kernel(%arg0: i32, %arg1: i32, %arg2: i32, %arg3: memref<1x48x256xbf16, #tpu.memory_space<vmem>>, %arg4: memref<8x48xbf16, #tpu.memory_space<vmem>>, %arg5: memref<8x1xf32, #tpu.memory_space<vmem>>, %arg6: memref<1x8x256xf32, #tpu.memory_space<vmem>>, %arg7: memref<8x1xf32, #tpu.memory_space<vmem>>, %arg8: memref<8x1xf32, #tpu.memory_space<vmem>>) attributes {dimension_semantics = [#tpu.dimension_semantics<parallel>, #tpu.dimension_semantics<parallel>, #tpu.dimension_semantics<arbitrary>], iteration_bounds = array<i64: 2, 1, 1>, scalar_prefetch = 0 : i64, scratch_operands = 2 : i64, tpu.core_type = #tpu.core_type<tc>, window_params = [{transform_indices = @transform_0, window_bounds = array<i64: 1, 48, 256>}, {transform_indices = @transform_1, window_bounds = array<i64: 8, 48>}, {transform_indices = @transform_2, window_bounds = array<i64: 8, 1>}, {transform_indices = @transform_3, window_bounds = array<i64: 1, 8, 256>}]} {
    %c0_i32 = arith.constant 0 : i32
    %0 = arith.cmpi eq, %arg2, %c0_i32 : i32
    %1 = arith.extui %0 : i1 to i32
    %c0_i32_0 = arith.constant 0 : i32
    %2 = arith.cmpi ne, %1, %c0_i32_0 : i32
    scf.if %2 {
      %cst_22 = arith.constant 0.000000e+00 : f32
      %33 = vector.broadcast %cst_22 : f32 to vector<8x1xf32>
      %c0_23 = arith.constant 0 : index
      %c0_24 = arith.constant 0 : index
      %34 = vector.load %arg7[%c0_23, %c0_24] : memref<8x1xf32, #tpu.memory_space<vmem>>, vector<8x1xf32>
      tpu.vector_store %arg7[%c0_23, %c0_24], %33 {strides = array<i32>} : memref<8x1xf32, #tpu.memory_space<vmem>>, vector<8x1xf32>,
      %cst_25 = arith.constant 0.000000e+00 : f32
      %35 = vector.broadcast %cst_25 : f32 to vector<8x1xf32>
      %c0_26 = arith.constant 0 : index
      %c0_27 = arith.constant 0 : index
      %36 = vector.load %arg8[%c0_26, %c0_27] : memref<8x1xf32, #tpu.memory_space<vmem>>, vector<8x1xf32>
      tpu.vector_store %arg8[%c0_26, %c0_27], %35 {strides = array<i32>} : memref<8x1xf32, #tpu.memory_space<vmem>>, vector<8x1xf32>,
    } else {
    }
    %c0 = arith.constant 0 : index
    %c0_1 = arith.constant 0 : index
    %3 = vector.load %arg4[%c0, %c0_1] : memref<8x48xbf16, #tpu.memory_space<vmem>>, vector<8x48xbf16>
    %c0_2 = arith.constant 0 : index
    %c0_3 = arith.constant 0 : index
    %c0_4 = arith.constant 0 : index
    %4 = vector.load %arg3[%c0_2, %c0_3, %c0_4] : memref<1x48x256xbf16, #tpu.memory_space<vmem>>, vector<1x48x256xbf16>
    %5 = vector.shape_cast %4 : vector<1x48x256xbf16> to vector<48x256xbf16>
    %cst = arith.constant dense<0.000000e+00> : vector<8x256xf32>
    %6 = tpu.matmul %3, %5, %cst {dimension_numbers = #tpu.dot_dimension_numbers<[1], [0], [0], [1], [0, 0, 1, 1], [], []>} : vector<8x48xbf16>, vector<48x256xbf16>, vector<8x256xf32> -> vector<8x256xf32>
    %c0_5 = arith.constant 0 : index
    %c0_6 = arith.constant 0 : index
    %7 = vector.load %arg5[%c0_5, %c0_6] : memref<8x1xf32, #tpu.memory_space<vmem>>, vector<8x1xf32>
    %8 = vector.broadcast %7 : vector<8x1xf32> to vector<8x256xf32>
    %9 = arith.addf %6, %8 : vector<8x256xf32>
    %cst_7 = arith.constant 0.00999999977 : f32
    %10 = vector.broadcast %cst_7 : f32 to vector<8x256xf32>
    %11 = arith.mulf %10, %9 : vector<8x256xf32>
    %12 = arith.maximumf %9, %11 : vector<8x256xf32>
    %c0_8 = arith.constant 0 : index
    %c0_9 = arith.constant 0 : index
    %13 = vector.load %arg7[%c0_8, %c0_9] : memref<8x1xf32, #tpu.memory_space<vmem>>, vector<8x1xf32>
    %cst_10 = arith.constant dense<0.000000e+00> : vector<8xf32>
    %14 = vector.multi_reduction <add>, %12, %cst_10 [1] : vector<8x256xf32> to vector<8xf32>
    %15 = vector.shape_cast %14 : vector<8xf32> to vector<8x1xf32>
    %16 = arith.addf %13, %15 : vector<8x1xf32>
    %c0_11 = arith.constant 0 : index
    %c0_12 = arith.constant 0 : index
    %17 = vector.load %arg7[%c0_11, %c0_12] : memref<8x1xf32, #tpu.memory_space<vmem>>, vector<8x1xf32>
    tpu.vector_store %arg7[%c0_11, %c0_12], %16 {strides = array<i32>} : memref<8x1xf32, #tpu.memory_space<vmem>>, vector<8x1xf32>,
    %c0_13 = arith.constant 0 : index
    %c0_14 = arith.constant 0 : index
    %18 = vector.load %arg8[%c0_13, %c0_14] : memref<8x1xf32, #tpu.memory_space<vmem>>, vector<8x1xf32>
    %19 = arith.mulf %12, %12 : vector<8x256xf32>
    %cst_15 = arith.constant dense<0.000000e+00> : vector<8xf32>
    %20 = vector.multi_reduction <add>, %19, %cst_15 [1] : vector<8x256xf32> to vector<8xf32>
    %21 = vector.shape_cast %20 : vector<8xf32> to vector<8x1xf32>
    %22 = arith.addf %18, %21 : vector<8x1xf32>
    %c0_16 = arith.constant 0 : index
    %c0_17 = arith.constant 0 : index
    %23 = vector.load %arg8[%c0_16, %c0_17] : memref<8x1xf32, #tpu.memory_space<vmem>>, vector<8x1xf32>
    tpu.vector_store %arg8[%c0_16, %c0_17], %22 {strides = array<i32>} : memref<8x1xf32, #tpu.memory_space<vmem>>, vector<8x1xf32>,
    %c256_i32 = arith.constant 256 : i32
    %24 = arith.muli %arg2, %c256_i32 : i32
    %25 = tpu.assume_multiple %24, 256 : i32
    %c0_18 = arith.constant 0 : index
    %c0_19 = arith.constant 0 : index
    %26 = arith.index_cast %25 : i32 to index
    %27 = vector.load %arg6[%c0_18, %c0_19, %26] : memref<1x8x256xf32, #tpu.memory_space<vmem>>, vector<1x8x256xf32>
    %28 = vector.shape_cast %27 : vector<1x8x256xf32> to vector<8x256xf32>
    %29 = vector.shape_cast %12 : vector<8x256xf32> to vector<1x8x256xf32>
    tpu.vector_store %arg6[%c0_18, %c0_19, %26], %29 {strides = array<i32>} : memref<1x8x256xf32, #tpu.memory_space<vmem>>, vector<1x8x256xf32>,
    %c0_i32_20 = arith.constant 0 : i32
    %30 = arith.cmpi eq, %arg2, %c0_i32_20 : i32
    %31 = arith.extui %30 : i1 to i32
    %c0_i32_21 = arith.constant 0 : i32
    %32 = arith.cmpi ne, %31, %c0_i32_21 : i32
    scf.if %32 {
      %c0_22 = arith.constant 0 : index
      %c0_23 = arith.constant 0 : index
      %33 = vector.load %arg7[%c0_22, %c0_23] : memref<8x1xf32, #tpu.memory_space<vmem>>, vector<8x1xf32>
      %cst_24 = arith.constant 3.906250e-03 : f32
      %34 = vector.broadcast %cst_24 : f32 to vector<8x1xf32>
      %35 = arith.mulf %33, %34 : vector<8x1xf32>
      %c0_25 = arith.constant 0 : index
      %c0_26 = arith.constant 0 : index
      %36 = vector.load %arg8[%c0_25, %c0_26] : memref<8x1xf32, #tpu.memory_space<vmem>>, vector<8x1xf32>
      %cst_27 = arith.constant 3.906250e-03 : f32
      %37 = vector.broadcast %cst_27 : f32 to vector<8x1xf32>
      %38 = arith.mulf %36, %37 : vector<8x1xf32>
      %39 = arith.mulf %35, %35 : vector<8x1xf32>
      %40 = arith.subf %38, %39 : vector<8x1xf32>
      %cst_28 = arith.constant 9.99999974E-6 : f32
      %41 = vector.broadcast %cst_28 : f32 to vector<8x1xf32>
      %42 = arith.addf %40, %41 : vector<8x1xf32>
      %43 = math.rsqrt %42 : vector<8x1xf32>
      %c0_29 = arith.constant 0 : index
      %c0_30 = arith.constant 0 : index
      %c0_31 = arith.constant 0 : index
      %44 = vector.load %arg6[%c0_29, %c0_30, %c0_31] : memref<1x8x256xf32, #tpu.memory_space<vmem>>, vector<1x8x256xf32>
      %45 = vector.shape_cast %44 : vector<1x8x256xf32> to vector<8x256xf32>
      %46 = vector.broadcast %35 : vector<8x1xf32> to vector<8x256xf32>
      %47 = arith.subf %45, %46 : vector<8x256xf32>
      %48 = vector.broadcast %43 : vector<8x1xf32> to vector<8x256xf32>
      %49 = arith.mulf %47, %48 : vector<8x256xf32>
      %c0_32 = arith.constant 0 : index
      %c0_33 = arith.constant 0 : index
      %c0_34 = arith.constant 0 : index
      %50 = vector.load %arg6[%c0_32, %c0_33, %c0_34] : memref<1x8x256xf32, #tpu.memory_space<vmem>>, vector<1x8x256xf32>
      %51 = vector.shape_cast %50 : vector<1x8x256xf32> to vector<8x256xf32>
      %52 = vector.shape_cast %49 : vector<8x256xf32> to vector<1x8x256xf32>
      tpu.vector_store %arg6[%c0_32, %c0_33, %c0_34], %52 {strides = array<i32>} : memref<1x8x256xf32, #tpu.memory_space<vmem>>, vector<1x8x256xf32>,
    } else {
    }
    return
  }
  func.func @transform_0(%arg0: i32, %arg1: i32, %arg2: i32) -> (i32, i32, i32) {
    %c0_i32 = arith.constant 0 : i32
    %c0_i32_0 = arith.constant 0 : i32
    return %arg0, %c0_i32, %arg2 : i32, i32, i32
  }
  func.func @transform_1(%arg0: i32, %arg1: i32, %arg2: i32) -> (i32, i32) {
    %c0_i32 = arith.constant 0 : i32
    %c0_i32_0 = arith.constant 0 : i32
    return %arg1, %c0_i32 : i32, i32
  }
  func.func @transform_2(%arg0: i32, %arg1: i32, %arg2: i32) -> (i32, i32) {
    %c0_i32 = arith.constant 0 : i32
    %c0_i32_0 = arith.constant 0 : i32
    return %arg1, %c0_i32 : i32, i32
  }
  func.func @transform_3(%arg0: i32, %arg1: i32, %arg2: i32) -> (i32, i32, i32) {
    %c0_i32 = arith.constant 0 : i32
    %c0_i32_0 = arith.constant 0 : i32
    return %arg0, %arg1, %c0_i32 : i32, i32, i32
  }
}

</mosaic_0001>

<bundles_post_ra>
// kernel: tpu_custom_call.1
= control target key start
LH: loop header
LB: loop body
LE: loop exit
PB: predicated region body
PF: predicated region fallthrough
CT: control target
= control target key end

     0   :  { %8 = vsyncpa [#allocation5], 0  ;;  %s924_s0 = inlined_call_operand.hbm [shape: bf16[2,48,256], index: 0, kind: input, shape index: {}]   ;;  %s925_s1 = inlined_call_operand.vmem [shape: bf16[8,48], index: 1, kind: input, shape index: {}]   ;;  %s926_s2 = inlined_call_operand.vmem [shape: f32[8,1], index: 2, kind: input, shape index: {}]   ;;  %s927_s3 = inlined_call_operand.hbm [shape: f32[2,8,256], index: 3, kind: output, shape index: {}]  }
   0x1   :  { %10 = vsyncpa [#allocation5 + $0x1], 0 }
   0x2   :  { %11 = vsyncpa [#allocation6], 0 }
   0x3   :  { %13 = vsyncpa [#allocation6 + $0x1], 0  ;;  %s793_s12 = smov 0   ;;  %s795_s13 = smov 0  }
   0x4   :  { %s797_s14 = smov 0   ;;  %s799_s15 = smov 0  }
   0x5   :  { %s801_s16 = smov 0   ;;  %s803_s17 = smov 0  }
   0x6 LB: > { %s534_s18 = sadd.s32 4294967295, %s767_s17   ;;  %s535_s19 = sadd.s32 4294967294, %s767_s17   ;;  %s767_s17 = sphi %s803_s17, %s19_s17   ;;  %s763_s16 = sphi %s801_s16, %s936_s16   ;;  %s759_s15 = sphi %s799_s15, %s935_s15   ;;  %s755_s14 = sphi %s797_s14, %s934_s14   ;;  %s751_s13 = sphi %s795_s13, %s933_s13   ;;  %s747_s12 = sphi %s793_s12, %s932_s12  }
   0x7   : > { %s38_s20 = sadd.s32 1, %s763_s16  ;;  %s47_s21 = sadd.s32 1, %s755_s14 }
   0x8   : > { %p40_p0 = scmp.ge.s32.totalorder %s38_s20, 2  ;;  %p54_p1 = scmp.ne.s32.totalorder %s755_s14, %s751_s13 }
   0x9   : > { %p55_p2 = scmp.eq.s32.totalorder %s767_s17, 0  ;;  %p60_p3 = scmp.ne.s32.totalorder %s751_s13, %s747_s12 }
   0xa   : > { %s938_s20 = smov (%p40_p0, %s38_s20), 0  ;;  %p61_p5 = scmp.eq.s32.totalorder %s534_s18, 0 }
   0xb   : > { %p834_p4 = por %p55_p2, %p54_p1  ;;  %s42_s23 = ssub.s32 %s763_s16, %s938_s20 }
   0xc   : > { %p138_p6 = scmp.eq.s32.totalorder %s534_s18, 1  ;;  %p45_p7 = scmp.eq.s32.totalorder %s42_s23, 0 }
   0xd   : > { %p840_p8 = por %p61_p5, %p60_p3  ;;  %p144_p10 = scmp.eq.s32.totalorder %s535_s19, 1 }
   0xe   : > { %p844_p9 = por %p138_p6, %p54_p1  ;;  %p539_p12 = scmp.ge.s32.totalorder %s767_s17, 2 }
   0xf   : > { %s849_s26 = scalar_select %p45_p7, %s755_s14, %s47_s21  }
  0x10   : > { %p851_p11 = por %p144_p10, %p60_p3  ;;  %p596_p13 = scmp.lt.s32.totalorder %s767_s17, 2 }
  0x11   : > { %s178_s28 = sand.u32 1, %s755_s14   ;;  %s582_s30 = smul.u32 48, %s763_s16 }
  0x12   : > { %s581_s29 = smul.u32 48, %s178_s28  ;;  %p589_p0 = pnand %p596_p13, %p834_p4 }
  0x13   : > { %s189_s6 = scalar_lea.hbm %s924_s0, %s582_s30  ;;  %p541_p1 = scmp.ge.s32.totalorder %s767_s17, 1 }
  0x14   : > { %s182_s7 = scalar_lea.vmem [#allocation4], %s581_s29  ;;  %s190_s9 = sshll.u32 %s189_s6, 4  ;;  %s191_s9 = int_to_ptr.hbm [resolvable:$true] %s190_s9 }
  0x15   : > { %s192_s8 = sshll.u32 %s182_s7, 4  ;;  %s179_s10 = scalar_lea.sflag [#allocation5], %s178_s28  ;;  %s193_s8 = int_to_ptr.vmem [resolvable:$true] %s192_s8 }
  0x16   : > { %s769_s11 = smov 128   ;;  %s770_s18 = smov 8  }
  0x17   : > { %591 = dma.hbm_to_vmem [thread:$0]  (!%p589_p0), %s191_s9, 768, %s193_s8, %s179_s10, %s769_s11, %s769_s11, %s770_s18  }
  0x18   : > { %p200_p2 = scmp.lt.s32.totalorder %s767_s17, 3 }
  0x1a   : > { %p201_p3 = pnand %p541_p1, %p200_p2 }
  0x1b   : > { %s867_s19 = sand.u32 (!%p201_p3), 1, %s751_s13  }
  0x1c   : > { %204 = sbr.rel (%p201_p3) target bundleno = 434 (0x1b2), region = 32  ;;  %s207_s22 = scalar_lea.sflag (!%p201_p3), [#allocation5], %s867_s19 }
  0x1d   : > { %s583_s21 = smul.u32 (!%p201_p3), 48, %s867_s19 }
  0x1f   : > { %s210_s23 = scalar_lea.vmem (!%p201_p3), [#allocation4], %s583_s21 }
  0x21   : > { %738 = dma.done.wait (%p840_p8), %s207_s22, 768  }
  0x22   : > { %740 = vsyncadd (%p840_p8), %s207_s22, 4294966528  ;;  %v771_v0 = vmov 0   ;;  %v561_v1 = vld [vmem:[%s210_s23 + $0x20] sm:$0xf]  ;;  %v579_v2 = vld [vmem:[%s210_s23 + $0x24] sm:$0xf0] }
  0x23   : > { %650 = vset.pattern.permute.xlu0 %v771_v0  ;;  %651 = vset.pattern.permute.xlu1 %v771_v0  ;;  %v578_v3 = vld [vmem:[%s210_s23 + $0x24] sm:$0xf]  ;;  %v562_v4 = vor.u32 %v579_v2, %v561_v1  ;;  %v563_v5 = vld [vmem:[%s210_s23 + $0x28] sm:$0xf0]  ;;  %v553_v6 = vld [vmem:[%s210_s23 + $0x10] sm:$0xf] }
  0x24   : > { %652 = vset.pattern.permute.xlu2 %v771_v0  ;;  %v577_v7 = vld [vmem:[%s210_s23 + $0x14] sm:$0xf0]  ;;  %v566_v8 = vor.u32 %v578_v3, %v563_v5  ;;  %v576_v9 = vld [vmem:[%s210_s23 + $0x14] sm:$0xf]  ;;  %v555_v10 = vld [vmem:[%s210_s23 + $0x18] sm:$0xf0] }
  0x25   : > { %311 = vmatpush.bf16.msra.mxu0 %v562_v4  ;;  %v554_v11 = vor.u32 %v577_v7, %v553_v6  ;;  %v558_v12 = vor.u32 %v576_v9, %v555_v10  ;;  %v545_v13 = vld [vmem:[%s210_s23] sm:$0xf]  ;;  %v575_v14 = vld [vmem:[%s210_s23 + $0x4] sm:$0xf0]  ;;  %v574_v16 = vld [vmem:[%s210_s23 + $0x4] sm:$0xf] }
  0x26   : > { %324 = vmatpush.bf16.msra.mxu1 %v566_v8  ;;  %v266_v15 = vld [vmem:[%s926_s2] sm:$0xff]  ;;  %v547_v17 = vld [vmem:[%s210_s23 + $0x8] sm:$0xf0]  ;;  %v546_v18 = vor.u32 %v575_v14, %v545_v13  ;;  %vm302_vm0 = vcmask 392192   ;;  %vm256_vm1 = vcmask 7168   ;;  %v772_v21 = vmov 0.0  }
  0x27   : > { %269 = vperm.xlu0 %650, %v266_v15   ;;  %v550_v19 = vor.u32 %v574_v16, %v547_v17  ;;  %v259_v20 = vld [vmem:[%s925_s1] sm:$0xf]  ;;  %257 = vst.msk [vmem:[#allocation2] sm:$0xff] %vm256_vm1, %v772_v21  ;;  %s542_s4 = sshll.u32 %s867_s19, 4  ;;  %s580_s5 = sshll.u32 %s759_s15, 4 }
  0x28   : > { %258 = vst.msk [vmem:[#allocation3] sm:$0xff] %vm256_vm1, %v772_v21  ;;  %s410_s8 = scalar_lea.hbm %s927_s3, %s580_s5  ;;  %s241_s9 = scalar_lea.vmem [#allocation7], %s542_s4 }
  0x29   : > { %312 = vmatpush.bf16.msra.mxu0 %v554_v11  ;;  %s412_s10 = sshll.u32 %s241_s9, 4  ;;  %s414_s11 = sshll.u32 %s410_s8, 4  ;;  %s413_s10 = int_to_ptr.vmem [resolvable:$true] %s412_s10  ;;  %s415_s11 = int_to_ptr.hbm [resolvable:$true] %s414_s11 }
  0x2a   : > { %325 = vmatpush.bf16.msra.mxu1 %v558_v12  ;;  %s397_s18 = scalar_lea.sflag [#allocation6], %s867_s19  ;;  %s699_s15 = sshra.s32 %s415_s11, 4  ;;  %s700_s15 = int_to_ptr.hbm [resolvable:$true] %s699_s15 }
  0x2b   : > { %s701_s21 = scalar_lea.hbm %s700_s15, 16  ;;  %s705_s24 = scalar_lea.hbm %s927_s3, 32 }
  0x2c   : > { %p702_p4 = scmp.ne.s32.totalorder %s700_s15, %s701_s21  ;;  %p706_p7 = scmp.lt.s32.totalorder %s700_s15, %s927_s3 }
  0x2d   : > { %313 = vmatpush.bf16.msra.mxu0 %v546_v18  ;;  %p707_p8 = scmp.lt.s32.totalorder %s705_s24, %s701_s21 }
  0x2e   : > { %326 = vmatpush.bf16.msra.mxu1 %v550_v19  ;;  %v336_v37 = vld [vmem:[#allocation2] sm:$0xff]  ;;  %p703_p5 = pnand %p702_p4, %p844_p9 }
  0x2f   : > { %v343_v39 = vld [vmem:[#allocation3] sm:$0xff]  ;;  %p708_p10 = por %p707_p8, %p706_p7 }
  0x30   : > { %567 = vmatmul.msk.bf16.vlgmr.msra.gmra.mxu0 %vm302_vm0, %v259_v20  ;;  %p704_p6 = pneg %p703_p5 }
  0x31   : > { %568 = vmatmul.msk.bf16.vlgmr.msra.gmra.mxu1 %vm302_vm0, %v259_v20 }
  0x32   : > { %p709_p13 = pnand %p708_p10, %p704_p6 }
  0x99   : > { %v270_v22 = vpop.permute.xlu0 %269 }
  0xad   : > { %v315_v23 = vpop.f32.mrf.mxu0 }
  0xae   : > { %v316_v24 = vadd.f32 %v315_v23, %v270_v22  ;;  %v328_v25 = vpop.f32.mrf.mxu1 }
  0xaf   : > { %v329_v26 = vadd.f32 %v328_v25, %v270_v22 }
  0xb0   : > { %v332_v27 = vmul.f32 0.01, %v316_v24 }
  0xb1   : > { %v333_v28 = vmul.f32 0.01, %v329_v26 }
  0xb2   : > { %v334_v29 = vmax.f32 %v316_v24, %v332_v27 }
  0xb3   : > { %v335_v30 = vmax.f32 %v329_v26, %v333_v28 }
  0xb4   : > { %v344_v31 = vmul.f32 %v334_v29, %v334_v29 }
  0xb5   : > { %v317_v32 = vpop.f32.mrf.mxu0  ;;  %v337_v33 = vadd.f32 %v335_v30, %v334_v29  ;;  %v345_v34 = vmul.f32 %v335_v30, %v335_v30 }
  0xb6   : > { %v330_v35 = vpop.f32.mrf.mxu1 }
  0xb7   : > { %338 = vadd.xlane.f32.xlu0 %v337_v33  ;;  %v346_v36 = vadd.f32 %v345_v34, %v344_v31 }
  0xb9   : > { %347 = vadd.xlane.f32.xlu1 %v346_v36 }
 0x12a   : > { %v339_v38 = vpop.xlane.xlu0 %338 }
 0x12b   : > { %v340_v40 = vadd.f32 %v339_v38, %v336_v37 }
 0x12c   : > { %v348_v41 = vpop.xlane.xlu1 %347 }
 0x12d   : > { %342 = vst.msk [vmem:[#allocation2] sm:$0xff] %vm256_vm1, %v340_v40  ;;  %v349_v42 = vadd.f32 %v348_v41, %v343_v39 }
 0x12f   : > { %350 = vst.msk [vmem:[#allocation3] sm:$0xff] %vm256_vm1, %v349_v42 }
 0x134   : > { %v361_v43 = vld [vmem:[#allocation2] sm:$0xff] }
 0x135   : > { %v362_v44 = vmul.f32 0.00390625, %v361_v43 }
 0x136   : > { %v363_v45 = vld [vmem:[#allocation3] sm:$0xff] }
 0x137   : > { %v364_v46 = vmul.f32 0.00390625, %v363_v45  ;;  %382 = vperm.xlu1 %651, %v362_v44   ;;  %v365_v47 = vmul.f32 %v362_v44, %v362_v44 }
 0x139   : > { %v366_v48 = vsub.f32 %v364_v46, %v365_v47 }
 0x13b   : > { %v367_v49 = vadd.f32 1e-05, %v366_v48 }
 0x13d   : > { %653 = vrsqrt.f32 %v367_v49  ;;  %vm374_vm3 = vweird.f32 %v367_v49 }
 0x143   : > { %v654_v50 = vpop.eup %653 }
 0x144   : > { %v369_v51 = vmul.f32 %v654_v50, %v367_v49  ;;  %vm375_vm2 = vweird.f32 %v654_v50 }
 0x145   : > { %vm376_vm4 = vmor %vm374_vm3, %vm375_vm2 }
 0x146   : > { %v370_v52 = vmul.f32 %v654_v50, %v369_v51 }
 0x148   : > { %v371_v53 = vmul.f32 0.5, %v370_v52 }
 0x14a   : > { %v372_v54 = vsub.f32 1.5, %v371_v53 }
 0x14c   : > { %v373_v55 = vmul.f32 %v654_v50, %v372_v54 }
 0x14e   : > { %v377_v56 = vsel %vm376_vm4, %v654_v50, %v373_v55 }
 0x14f   : > { %389 = vperm.xlu2 %652, %v377_v56  }
 0x1a9   : > { %v383_v57 = vpop.permute.xlu1 %382  ;;  %v390_v60 = vpop.permute.xlu2 %389 }
 0x1aa   : > { %v385_v58 = vsub.f32 %v334_v29, %v383_v57  ;;  %v386_v59 = vsub.f32 %v335_v30, %v383_v57 }
 0x1ac   : > { %v392_v61 = vmul.f32 %v390_v60, %v385_v58  ;;  %v393_v62 = vmul.f32 %v390_v60, %v386_v59 }
 0x1ae   : > { %394 = vst [vmem:[%s241_s9] sm:$0xff] %v392_v61 }
 0x1af   : > { %395 = vst [vmem:[%s241_s9 + $0x8] sm:$0xff] %v393_v62 }
 0x1b0   : > { %712 = shalt.err (!%p709_p13)
}
 0x1b1   : > { %586 = dma.vmem_to_hbm [thread:$0]  (%p844_p9), %s413_s10, 256, %s415_s11, %s397_s18  }
 0x1b2 PF: > { %s426_s19 = sand.u32 1, %s747_s12   ;;  %p593_p0 = pnand %p539_p12, %p851_p11 }
 0x1b3   : > { %s427_s30 = scalar_lea.sflag [#allocation6], %s426_s19 }
 0x1b4   : > { %p594_p1 = pneg %p593_p0 }
 0x1b6   : > { %742 = dma.done.wait (%p594_p1), %s427_s30, 256  }
 0x1b7   : > { %744 = vsyncadd (%p594_p1), %s427_s30, 4294967040  ;;  %s19_s17 = sadd.s32 1, %s767_s17   ;;  %s932_s12 = smov %s751_s13 }
 0x1b8   : > { %p16_p2 = scmp.ge.s32.totalorder %s19_s17, 4   ;;  %s933_s13 = smov %s755_s14 }
 0x1b9   : > { %s934_s14 = smov %s849_s26  ;;  %s935_s15 = smov %s763_s16 }
 0x1ba   : > { %s936_s16 = smov %s938_s20  ;;  %18 = sbr.rel (!%p16_p2) target bundleno = 6 (0x6), region = 92 }
 0x1bf   :  { %433 = vsyncpa [#allocation5], 1 }
 0x1c0   :  { %435 = vsyncpa [#allocation5 + $0x1], 1 }
 0x1c1   :  { %436 = vsyncpa [#allocation6], 1 }
 0x1c2   :  { %438 = vsyncpa [#allocation6 + $0x1], 1 }

</bundles_post_ra>
